<compile_context>
chip_gen: v7x
topology: tpu7x:2x2x1
jax: 0.10.0
libtpu: 0.0.40
codegen_flags: <defaults>
</compile_context>

<pallas_src>
import jax
import jax.numpy as jnp
from jax.experimental import pallas as pl
from jax.experimental.pallas import tpu as pltpu


def critic_kernel(state_ref, act_ref,
                  emb_w0_ref, w0s_ref, w0a_ref,
                  w1_ref, b1_ref,
                  w2_ref, b2_ref,
                  w3_ref, b3_ref,
                  out_ref):
    wdt = w1_ref.dtype                                    # matmul operand dtype (f32 or bf16)
    T = state_ref.shape[0]
    V = emb_w0_ref.shape[0]

    state = state_ref[...]                                # [T, 1 + S] f32
    # torch: step = state[:, 0].long()  (truncation toward zero)
    step = state[:, 0:1].astype(jnp.int32)                # [T, 1]

    # one-hot(step) @ (emb @ W0_emb + b0)  ==  (emb[step] @ W0_emb + b0)  exactly
    ids = jax.lax.broadcasted_iota(jnp.int32, (T, V), 1)  # [T, V]
    onehot = (ids == step).astype(wdt)

    # fc0 split by concat blocks; w0s has a zero row 0 so the step column of
    # `state` contributes nothing (no lane slice needed).
    h = (jnp.dot(onehot, emb_w0_ref[...], preferred_element_type=jnp.float32)
         + jnp.dot(state.astype(wdt), w0s_ref[...],
                   preferred_element_type=jnp.float32)
         + jnp.dot(act_ref[...].astype(wdt), w0a_ref[...],
                   preferred_element_type=jnp.float32))   # [T, W] f32 (b0 folded)
    h = jnp.maximum(h, 0.0)

    h = jnp.dot(h.astype(wdt), w1_ref[...],
                preferred_element_type=jnp.float32) + b1_ref[...]
    h = jnp.maximum(h, 0.0)

    h = jnp.dot(h.astype(wdt), w2_ref[...],
                preferred_element_type=jnp.float32) + b2_ref[...]
    h = jnp.maximum(h, 0.0)

    # fc3: W -> 1.  VPU multiply + lane reduce (avoids an N=1 MXU matmul).
    q = jnp.sum(h * w3_ref[...], axis=-1, keepdims=True) + b3_ref[...]
    out_ref[...] = q                                      # [T, 1] f32


def prepare_params(raw, *, step_embedding_dim, net_state_dim,
                   weight_dtype=jnp.float32):
    """Fold embedding + b0 through fc0, split W0 by concat blocks, cast weights."""
    E, S = step_embedding_dim, net_state_dim
    w0 = raw["w0"]                                        # [E + S + A, W]
    W = w0.shape[1]
    emb_w0 = (jnp.dot(raw["emb"], w0[:E],
                      precision=jax.lax.Precision.HIGHEST)
              + raw["b0"])                                # [V, W], b0 folded in
    # zero row prepended: `state @ w0_state` ignores the step column.
    w0_state = jnp.concatenate(
        [jnp.zeros((1, W), jnp.float32), w0[E:E + S]], axis=0)   # [1 + S, W]
    w0_act = w0[E + S:]                                   # [A, W]
    wd = weight_dtype
    return {
        "emb_w0": emb_w0.astype(wd),
        "w0_state": w0_state.astype(wd),
        "w0_act": w0_act.astype(wd),
        "w1": raw["w1"].astype(wd), "b1": raw["b1"].astype(jnp.float32),
        "w2": raw["w2"].astype(wd), "b2": raw["b2"].astype(jnp.float32),
        "w3_row": raw["w3"].T.astype(jnp.float32),        # [1, W] (f32, used on VPU)
        "b3": raw["b3"].astype(jnp.float32),              # [1, 1]
    }


def critic_forward(state, action, params, *, tile_b=2048):
    """state: [B, 1 + S_net] f32 (col 0 = stage index), action: [B, A] f32."""
    B = state.shape[0]
    Sp1 = state.shape[1]
    A = action.shape[1]
    V, W = params["emb_w0"].shape
    W2 = params["w1"].shape[1]

    def round_up(x, m):
        return ((x + m - 1) // m) * m

    # Batch tile: multiple of 16 sublanes (bf16-friendly); capped so the grid
    # has >= 2 blocks (v7x has 2 TensorCores; "parallel" lets Mosaic shard them).
    tile_b = max(16, (int(tile_b) // 16) * 16)
    tile_b = min(tile_b, round_up(pl.cdiv(B, 2), 16))
    grid_b = pl.cdiv(B, tile_b)          # ragged last block: OOB reads padded, writes dropped

    def batch_spec(feat):
        return pl.BlockSpec((tile_b, feat), lambda i: (i, 0))

    def resident(a):                     # weights/biases: DMA'd once, VMEM-resident
        return pl.BlockSpec(a.shape, lambda i: (0, 0))

    weights = (params["emb_w0"], params["w0_state"], params["w0_act"],
               params["w1"], params["b1"],
               params["w2"], params["b2"],
               params["w3_row"], params["b3"])

    in_specs = [batch_spec(Sp1), batch_spec(A)] + [resident(a) for a in weights]

    weight_bytes = sum(int(a.size) * a.dtype.itemsize for a in weights)
    flops = 2 * B * (V * W + Sp1 * W + A * W + W * W2 + W2 * W + W)
    bytes_accessed = 4 * B * (Sp1 + A + 1) + weight_bytes

    out = pl.pallas_call(
        critic_kernel,
        out_shape=jax.ShapeDtypeStruct((B, 1), jnp.float32),
        grid=(grid_b,),
        in_specs=in_specs,
        out_specs=pl.BlockSpec((tile_b, 1), lambda i: (i, 0)),
        compiler_params=pltpu.CompilerParams(
            dimension_semantics=("parallel",),
            vmem_limit_bytes=32 * 1024 * 1024),
        cost_estimate=pl.CostEstimate(flops=flops, transcendentals=0,
                                      bytes_accessed=bytes_accessed),
    )(state, action, *weights)

    return jnp.squeeze(out)              # torch .squeeze(): (B,) for B>1, scalar for B==1


def critic_forward_ref(state, action, raw):
    """Pure-JAX reference mirroring the PyTorch Critic.forward (true f32 math)."""
    hp = jax.lax.Precision.HIGHEST
    step = state[:, 0].astype(jnp.int32)
    net_state = state[:, 1:]
    x = raw["emb"][step]
    x = jnp.concatenate([x, net_state, action], axis=-1)
    x = jnp.maximum(jnp.dot(x, raw["w0"], precision=hp) + raw["b0"], 0.0)
    x = jnp.maximum(jnp.dot(x, raw["w1"], precision=hp) + raw["b1"], 0.0)
    x = jnp.maximum(jnp.dot(x, raw["w2"], precision=hp) + raw["b2"], 0.0)
    q = jnp.dot(x, raw["w3"], precision=hp) + raw["b3"]
    return jnp.squeeze(q)


def init_params(key, *, state_dim, action_dim, critic_net_width,
                num_stages, step_embedding_dim):
    """Synthetic init matching Critic.__init__ shapes.

    PyTorch Linear weight is [out, in]; stored here transposed as [in, out].
    Weights ~ N(0, 0.01) (nn.init.normal_), biases ~ U(-1/sqrt(fan_in), ...),
    embedding ~ N(0, 1).
    """
    W = critic_net_width
    E = step_embedding_dim
    V = num_stages + 10
    in0 = state_dim + action_dim
    ks = jax.random.split(key, 9)

    def lin_w(k, fi, fo):
        return 0.01 * jax.random.normal(k, (fi, fo), jnp.float32)

    def lin_b(k, fi, fo):
        bound = 1.0 / jnp.sqrt(jnp.float32(fi))
        return jax.random.uniform(k, (1, fo), jnp.float32, -bound, bound)

    return {
        "emb": jax.random.normal(ks[0], (V, E), jnp.float32),
        "w0": lin_w(ks[1], in0, W),   "b0": lin_b(ks[2], in0, W),
        "w1": lin_w(ks[3], W, 2 * W), "b1": lin_b(ks[4], W, 2 * W),
        "w2": lin_w(ks[5], 2 * W, W), "b2": lin_b(ks[6], 2 * W, W),
        "w3": lin_w(ks[7], W, 1),     "b3": lin_b(ks[8], W, 1),
    }


if __name__ == "__main__":
    cfg = dict(state_dim=32, action_dim=8, critic_net_width=32,
               num_stages=6, step_embedding_dim=8)
    E = cfg["step_embedding_dim"]
    S_net = cfg["state_dim"] - E                          # 24
    V = cfg["num_stages"] + 10                            # 16
    B = 20                                                # exercises a 2-block grid w/ ragged tail

    key = jax.random.PRNGKey(0)
    kp, ks, kn, ka = jax.random.split(key, 4)
    raw = init_params(kp, **cfg)

    # state[:, 0] holds integer stage indices (as floats, like the torch module).
    steps = jax.random.randint(ks, (B, 1), 0, V).astype(jnp.float32)
    net_state = jax.random.normal(kn, (B, S_net), jnp.float32)
    state = jnp.concatenate([steps, net_state], axis=-1)  # [B, 1 + S_net] = [20, 25]
    action = jax.random.normal(ka, (B, cfg["action_dim"]), jnp.float32)

    ref = critic_forward_ref(state, action, raw)

    # f32 weights: matches original module semantics.
    p32 = prepare_params(raw, step_embedding_dim=E, net_state_dim=S_net,
                         weight_dtype=jnp.float32)
    q32 = jax.block_until_ready(critic_forward(state, action, p32))
    assert q32.shape == ref.shape == (B,)
    assert jnp.allclose(q32, ref, atol=1e-3, rtol=1e-3), "f32 mismatch vs reference"

    # bf16 matmul operands (MXU-native on all generations; preferred on v5e),
    # f32 accumulate + f32 bias/ReLU.
    pbf = prepare_params(raw, step_embedding_dim=E, net_state_dim=S_net,
                         weight_dtype=jnp.bfloat16)
    qbf = jax.block_until_ready(critic_forward(state, action, pbf))
    assert jnp.allclose(qbf, ref, atol=1e-2, rtol=5e-2), "bf16 mismatch vs reference"

    # TODO(synk): like nn.Embedding, out-of-range step indices are not checked;
    # here they produce a zero one-hot row (and, with b0 folded, no bias) instead
    # of an error.
    print("KERNEL_OK")
</pallas_src>

<mosaic_0001>
module attributes {stable_mosaic.version = 11 : i64} {
  func.func @critic_kernel(%arg0: i32, %arg1: memref<16x25xf32, #tpu.memory_space<vmem>>, %arg2: memref<16x8xf32, #tpu.memory_space<vmem>>, %arg3: memref<16x32xf32, #tpu.memory_space<vmem>>, %arg4: memref<25x32xf32, #tpu.memory_space<vmem>>, %arg5: memref<8x32xf32, #tpu.memory_space<vmem>>, %arg6: memref<32x64xf32, #tpu.memory_space<vmem>>, %arg7: memref<1x64xf32, #tpu.memory_space<vmem>>, %arg8: memref<64x32xf32, #tpu.memory_space<vmem>>, %arg9: memref<1x32xf32, #tpu.memory_space<vmem>>, %arg10: memref<1x32xf32, #tpu.memory_space<vmem>>, %arg11: memref<1x1xf32, #tpu.memory_space<vmem>>, %arg12: memref<16x1xf32, #tpu.memory_space<vmem>>) attributes {dimension_semantics = [#tpu.dimension_semantics<parallel>], iteration_bounds = array<i64: 2>, scalar_prefetch = 0 : i64, scratch_operands = 0 : i64, tpu.core_type = #tpu.core_type<tc>, window_params = [{transform_indices = @transform_0, window_bounds = array<i64: 16, 25>}, {transform_indices = @transform_1, window_bounds = array<i64: 16, 8>}, {pipeline_mode = #tpu.pipeline_mode<synchronous>, transform_indices = @transform_2, window_bounds = array<i64: 16, 32>}, {pipeline_mode = #tpu.pipeline_mode<synchronous>, transform_indices = @transform_3, window_bounds = array<i64: 25, 32>}, {pipeline_mode = #tpu.pipeline_mode<synchronous>, transform_indices = @transform_4, window_bounds = array<i64: 8, 32>}, {pipeline_mode = #tpu.pipeline_mode<synchronous>, transform_indices = @transform_5, window_bounds = array<i64: 32, 64>}, {pipeline_mode = #tpu.pipeline_mode<synchronous>, transform_indices = @transform_6, window_bounds = array<i64: 1, 64>}, {pipeline_mode = #tpu.pipeline_mode<synchronous>, transform_indices = @transform_7, window_bounds = array<i64: 64, 32>}, {pipeline_mode = #tpu.pipeline_mode<synchronous>, transform_indices = @transform_8, window_bounds = array<i64: 1, 32>}, {pipeline_mode = #tpu.pipeline_mode<synchronous>, transform_indices = @transform_9, window_bounds = array<i64: 1, 32>}, {pipeline_mode = #tpu.pipeline_mode<synchronous>, transform_indices = @transform_10, window_bounds = array<i64: 1, 1>}, {transform_indices = @transform_11, window_bounds = array<i64: 16, 1>}]} {
    %c0 = arith.constant 0 : index
    %c0_0 = arith.constant 0 : index
    %0 = vector.load %arg1[%c0, %c0_0] : memref<16x25xf32, #tpu.memory_space<vmem>>, vector<16x25xf32>
    %1 = vector.extract_strided_slice %0 {offsets = [0, 0], sizes = [16, 1], strides = [1, 1]} : vector<16x25xf32> to vector<16x1xf32>
    %2 = arith.fptosi %1 : vector<16x1xf32> to vector<16x1xi32>
    %3 = tpu.iota {dimensions = array<i32: 1>} : vector<16x16xi32>
    %4 = vector.broadcast %2 : vector<16x1xi32> to vector<16x16xi32>
    %5 = arith.cmpi eq, %3, %4 : vector<16x16xi32>
    %6 = arith.extui %5 : vector<16x16xi1> to vector<16x16xi32>
    %7 = arith.sitofp %6 : vector<16x16xi32> to vector<16x16xf32>
    %c0_1 = arith.constant 0 : index
    %c0_2 = arith.constant 0 : index
    %8 = vector.load %arg3[%c0_1, %c0_2] : memref<16x32xf32, #tpu.memory_space<vmem>>, vector<16x32xf32>
    %cst = arith.constant dense<0.000000e+00> : vector<16x32xf32>
    %9 = tpu.matmul %7, %8, %cst {dimension_numbers = #tpu.dot_dimension_numbers<[1], [0], [0], [1], [0, 0, 1, 1], [], []>} : vector<16x16xf32>, vector<16x32xf32>, vector<16x32xf32> -> vector<16x32xf32>
    %c0_3 = arith.constant 0 : index
    %c0_4 = arith.constant 0 : index
    %10 = vector.load %arg4[%c0_3, %c0_4] : memref<25x32xf32, #tpu.memory_space<vmem>>, vector<25x32xf32>
    %cst_5 = arith.constant dense<0.000000e+00> : vector<16x32xf32>
    %11 = tpu.matmul %0, %10, %cst_5 {dimension_numbers = #tpu.dot_dimension_numbers<[1], [0], [0], [1], [0, 0, 1, 1], [], []>} : vector<16x25xf32>, vector<25x32xf32>, vector<16x32xf32> -> vector<16x32xf32>
    %12 = arith.addf %9, %11 : vector<16x32xf32>
    %c0_6 = arith.constant 0 : index
    %c0_7 = arith.constant 0 : index
    %13 = vector.load %arg2[%c0_6, %c0_7] : memref<16x8xf32, #tpu.memory_space<vmem>>, vector<16x8xf32>
    %c0_8 = arith.constant 0 : index
    %c0_9 = arith.constant 0 : index
    %14 = vector.load %arg5[%c0_8, %c0_9] : memref<8x32xf32, #tpu.memory_space<vmem>>, vector<8x32xf32>
    %cst_10 = arith.constant dense<0.000000e+00> : vector<16x32xf32>
    %15 = tpu.matmul %13, %14, %cst_10 {dimension_numbers = #tpu.dot_dimension_numbers<[1], [0], [0], [1], [0, 0, 1, 1], [], []>} : vector<16x8xf32>, vector<8x32xf32>, vector<16x32xf32> -> vector<16x32xf32>
    %16 = arith.addf %12, %15 : vector<16x32xf32>
    %cst_11 = arith.constant 0.000000e+00 : f32
    %17 = vector.broadcast %cst_11 : f32 to vector<16x32xf32>
    %18 = arith.maximumf %16, %17 : vector<16x32xf32>
    %c0_12 = arith.constant 0 : index
    %c0_13 = arith.constant 0 : index
    %19 = vector.load %arg6[%c0_12, %c0_13] : memref<32x64xf32, #tpu.memory_space<vmem>>, vector<32x64xf32>
    %cst_14 = arith.constant dense<0.000000e+00> : vector<16x64xf32>
    %20 = tpu.matmul %18, %19, %cst_14 {dimension_numbers = #tpu.dot_dimension_numbers<[1], [0], [0], [1], [0, 0, 1, 1], [], []>} : vector<16x32xf32>, vector<32x64xf32>, vector<16x64xf32> -> vector<16x64xf32>
    %c0_15 = arith.constant 0 : index
    %c0_16 = arith.constant 0 : index
    %21 = vector.load %arg7[%c0_15, %c0_16] : memref<1x64xf32, #tpu.memory_space<vmem>>, vector<1x64xf32>
    %22 = vector.broadcast %21 : vector<1x64xf32> to vector<16x64xf32>
    %23 = arith.addf %20, %22 : vector<16x64xf32>
    %cst_17 = arith.constant 0.000000e+00 : f32
    %24 = vector.broadcast %cst_17 : f32 to vector<16x64xf32>
    %25 = arith.maximumf %23, %24 : vector<16x64xf32>
    %c0_18 = arith.constant 0 : index
    %c0_19 = arith.constant 0 : index
    %26 = vector.load %arg8[%c0_18, %c0_19] : memref<64x32xf32, #tpu.memory_space<vmem>>, vector<64x32xf32>
    %cst_20 = arith.constant dense<0.000000e+00> : vector<16x32xf32>
    %27 = tpu.matmul %25, %26, %cst_20 {dimension_numbers = #tpu.dot_dimension_numbers<[1], [0], [0], [1], [0, 0, 1, 1], [], []>} : vector<16x64xf32>, vector<64x32xf32>, vector<16x32xf32> -> vector<16x32xf32>
    %c0_21 = arith.constant 0 : index
    %c0_22 = arith.constant 0 : index
    %28 = vector.load %arg9[%c0_21, %c0_22] : memref<1x32xf32, #tpu.memory_space<vmem>>, vector<1x32xf32>
    %29 = vector.broadcast %28 : vector<1x32xf32> to vector<16x32xf32>
    %30 = arith.addf %27, %29 : vector<16x32xf32>
    %cst_23 = arith.constant 0.000000e+00 : f32
    %31 = vector.broadcast %cst_23 : f32 to vector<16x32xf32>
    %32 = arith.maximumf %30, %31 : vector<16x32xf32>
    %c0_24 = arith.constant 0 : index
    %c0_25 = arith.constant 0 : index
    %33 = vector.load %arg10[%c0_24, %c0_25] : memref<1x32xf32, #tpu.memory_space<vmem>>, vector<1x32xf32>
    %34 = vector.broadcast %33 : vector<1x32xf32> to vector<16x32xf32>
    %35 = arith.mulf %32, %34 : vector<16x32xf32>
    %cst_26 = arith.constant dense<0.000000e+00> : vector<16xf32>
    %36 = vector.multi_reduction <add>, %35, %cst_26 [1] : vector<16x32xf32> to vector<16xf32>
    %37 = vector.shape_cast %36 : vector<16xf32> to vector<16x1xf32>
    %c0_27 = arith.constant 0 : index
    %c0_28 = arith.constant 0 : index
    %38 = vector.load %arg11[%c0_27, %c0_28] : memref<1x1xf32, #tpu.memory_space<vmem>>, vector<1x1xf32>
    %39 = vector.broadcast %38 : vector<1x1xf32> to vector<16x1xf32>
    %40 = arith.addf %37, %39 : vector<16x1xf32>
    %c0_29 = arith.constant 0 : index
    %c0_30 = arith.constant 0 : index
    %41 = vector.load %arg12[%c0_29, %c0_30] : memref<16x1xf32, #tpu.memory_space<vmem>>, vector<16x1xf32>
    tpu.vector_store %arg12[%c0_29, %c0_30], %40 {strides = array<i32>} : memref<16x1xf32, #tpu.memory_space<vmem>>, vector<16x1xf32>,
    return
  }
  func.func @transform_0(%arg0: i32) -> (i32, i32) {
    %c0_i32 = arith.constant 0 : i32
    %c0_i32_0 = arith.constant 0 : i32
    return %arg0, %c0_i32 : i32, i32
  }
  func.func @transform_1(%arg0: i32) -> (i32, i32) {
    %c0_i32 = arith.constant 0 : i32
    %c0_i32_0 = arith.constant 0 : i32
    return %arg0, %c0_i32 : i32, i32
  }
  func.func @transform_2(%arg0: i32) -> (i32, i32) {
    %c0_i32 = arith.constant 0 : i32
    %c0_i32_0 = arith.constant 0 : i32
    %c0_i32_1 = arith.constant 0 : i32
    return %c0_i32, %c0_i32_0 : i32, i32
  }
  func.func @transform_3(%arg0: i32) -> (i32, i32) {
    %c0_i32 = arith.constant 0 : i32
    %c0_i32_0 = arith.constant 0 : i32
    %c0_i32_1 = arith.constant 0 : i32
    return %c0_i32, %c0_i32_0 : i32, i32
  }
  func.func @transform_4(%arg0: i32) -> (i32, i32) {
    %c0_i32 = arith.constant 0 : i32
    %c0_i32_0 = arith.constant 0 : i32
    %c0_i32_1 = arith.constant 0 : i32
    return %c0_i32, %c0_i32_0 : i32, i32
  }
  func.func @transform_5(%arg0: i32) -> (i32, i32) {
    %c0_i32 = arith.constant 0 : i32
    %c0_i32_0 = arith.constant 0 : i32
    %c0_i32_1 = arith.constant 0 : i32
    return %c0_i32, %c0_i32_0 : i32, i32
  }
  func.func @transform_6(%arg0: i32) -> (i32, i32) {
    %c0_i32 = arith.constant 0 : i32
    %c0_i32_0 = arith.constant 0 : i32
    %c0_i32_1 = arith.constant 0 : i32
    return %c0_i32, %c0_i32_0 : i32, i32
  }
  func.func @transform_7(%arg0: i32) -> (i32, i32) {
    %c0_i32 = arith.constant 0 : i32
    %c0_i32_0 = arith.constant 0 : i32
    %c0_i32_1 = arith.constant 0 : i32
    return %c0_i32, %c0_i32_0 : i32, i32
  }
  func.func @transform_8(%arg0: i32) -> (i32, i32) {
    %c0_i32 = arith.constant 0 : i32
    %c0_i32_0 = arith.constant 0 : i32
    %c0_i32_1 = arith.constant 0 : i32
    return %c0_i32, %c0_i32_0 : i32, i32
  }
  func.func @transform_9(%arg0: i32) -> (i32, i32) {
    %c0_i32 = arith.constant 0 : i32
    %c0_i32_0 = arith.constant 0 : i32
    %c0_i32_1 = arith.constant 0 : i32
    return %c0_i32, %c0_i32_0 : i32, i32
  }
  func.func @transform_10(%arg0: i32) -> (i32, i32) {
    %c0_i32 = arith.constant 0 : i32
    %c0_i32_0 = arith.constant 0 : i32
    %c0_i32_1 = arith.constant 0 : i32
    return %c0_i32, %c0_i32_0 : i32, i32
  }
  func.func @transform_11(%arg0: i32) -> (i32, i32) {
    %c0_i32 = arith.constant 0 : i32
    %c0_i32_0 = arith.constant 0 : i32
    return %arg0, %c0_i32 : i32, i32
  }
}

</mosaic_0001>

<bundles_post_ra>
// kernel: tpu_custom_call.1
= control target key start
LH: loop header
LB: loop body
LE: loop exit
PB: predicated region body
PF: predicated region fallthrough
CT: control target
= control target key end

     0   :  { %s1768_s0 = inlined_call_operand.vmem [shape: f32[20,25], index: 0, kind: input, shape index: {}]   ;;  %s1769_s1 = inlined_call_operand.vmem [shape: f32[20,8], index: 1, kind: input, shape index: {}]   ;;  %s1770_s2 = inlined_call_operand.vmem [shape: f32[16,32], index: 2, kind: input, shape index: {}]   ;;  %s1771_s3 = inlined_call_operand.vmem [shape: f32[25,32], index: 3, kind: input, shape index: {}]   ;;  %s1772_s4 = inlined_call_operand.vmem [shape: f32[8,32], index: 4, kind: input, shape index: {}]   ;;  %s1773_s5 = inlined_call_operand.vmem [shape: f32[32,64], index: 5, kind: input, shape index: {}]   ;;  %s1774_s6 = inlined_call_operand.vmem [shape: f32[1,64], index: 6, kind: input, shape index: {}]   ;;  %s1775_s7 = inlined_call_operand.vmem [shape: f32[64,32], index: 7, kind: input, shape index: {}]   ;;  %s1776_s8 = inlined_call_operand.vmem [shape: f32[1,32], index: 8, kind: input, shape index: {}]   ;;  %s1777_s9 = inlined_call_operand.vmem [shape: f32[1,32], index: 9, kind: input, shape index: {}]   ;;  %s1778_s10 = inlined_call_operand.<no memory space> [shape: f32[1,1], index: 10, kind: input, shape index: {}]   ;;  %s1779_s11 = inlined_call_operand.vmem [shape: f32[20,1], index: 11, kind: output, shape index: {}]  }
   0x1   :  { %v16_v0 = vstv %s1778_s10 }
   0x2   :  { %17 = vst [vmem:[#allocation2] sm:$0x1] %v16_v0 }
   0x3   :  { %s1605_s19 = smov 0   ;;  %s1607_s20 = smov 0  }
   0x4   :  { %s1609_s21 = smov 0  }
   0x5 LB: > { %s1618_s10 = sadd.s32 4294967295, %s1505_s21   ;;  %s1620_s22 = sadd.s32 1, %s1505_s21   ;;  %s1505_s21 = sphi %s1609_s21, %s1783_s21   ;;  %s1501_s20 = sphi %s1607_s20, %s1782_s20   ;;  %s1497_s19 = sphi %s1605_s19, %s1781_s19  }
   0x6   : > { %s268_s23 = ssub.s32 %s1505_s21, %s1620_s22  ;;  %s271_s24 = sadd.s32 1, %s1501_s20 }
   0x7   : > { %p269_p0 = scmp.eq.s32.totalorder %s268_s23, 0  ;;  %p281_p1 = scmp.ne.s32.totalorder %s1501_s20, %s1497_s19 }
   0x8   : > { %p282_p2 = scmp.eq.s32.totalorder %s1618_s10, 1  ;;  %p1188_p3 = scmp.ge.s32.totalorder %s1505_s21, 1 }
   0x9   : > { %s1628_s25 = scalar_select %p269_p0, %s1501_s20, %s271_s24  }
   0xa   : > { %p1630_p4 = por %p282_p2, %p281_p1  ;;  %p367_p5 = scmp.lt.s32.totalorder %s1505_s21, 3 }
   0xc   : > { %p368_p6 = pnand %p1188_p3, %p367_p5 }
   0xd   : > { %s1635_s27 = sshll.u32 (!%p368_p6), %s1618_s10, 1  ;;  %v472_v1 = vld [vmem:[%s1771_s3] sm:$0xff] (!%p368_p6)  ;;  %v473_v2 = vld [vmem:[%s1771_s3 + $0x8] sm:$0xff] (!%p368_p6)  ;;  %v474_v3 = vld [vmem:[%s1771_s3 + $0x10] sm:$0xff] (!%p368_p6)  ;;  %vm483_vm0 = vcmask (!%p368_p6), 1040384   ;;  %v1539_v4 = vmov (!%p368_p6), 0   ;;  %v456_v21 = vlaneseq (!%p368_p6) }
   0xe   : > { %371 = sbr.rel (%p368_p6) target bundleno = 1024 (0x400), region = 64  ;;  %1450 = vset.pattern.permute.xlu0 (!%p368_p6), %v1539_v4  ;;  %p424_p7 = scmp.lt.s32.totalorder (!%p368_p6), %s1635_s27, 2  ;;  %v1313_v5 = vpack.c.bf16 (!%p368_p6), %v473_v2, %v472_v1  ;;  %v475_v6 = vld [vmem:[%s1771_s3 + $0x18] sm:$0x1] (!%p368_p6)  ;;  %vm1540_vm1 = vmmov (!%p368_p6), 1   ;;  %v470_v8 = vld [vmem:[%s1770_s2] sm:$0xff] (!%p368_p6) }
   0xf   : > { %v1317_v7 = vpack.c.bf16 (!%p368_p6), %v475_v6, %v474_v3  ;;  %vm1318_vm2 = vmpackc.low (!%p368_p6), %vm483_vm0, %vm1540_vm1  ;;  %v471_v9 = vld [vmem:[%s1770_s2 + $0x8] sm:$0xff] (!%p368_p6)  ;;  %vm476_vm3 = vcmask (!%p368_p6), 203776   ;;  %v646_v17 = vld [vmem:[%s1772_s4] sm:$0xff] (!%p368_p6)  ;;  %v457_v22 = vand.u32 (!%p368_p6), 127, %v456_v21  ;;  %vm562_vm4 = vcmask (!%p368_p6), 130048   ;;  %s416_s30 = sand.u32 (!%p368_p6), 1, %s1497_s19  }
  0x10   : > { %1314 = vmatprep.subr.bf16.mxu0 (!%p368_p6), %v1313_v5  ;;  %v1323_v10 = vpack.c.bf16 (!%p368_p6), %v471_v9, %v470_v8  ;;  %v733_v18 = vld [vmem:[%s1773_s5] sm:$0xff] (!%p368_p6)  ;;  %v734_v19 = vld [vmem:[%s1773_s5 + $0x8] sm:$0xff] (!%p368_p6)  ;;  %v1541_v24 = vmov (!%p368_p6), 0.0   ;;  %vm647_vm7 = vcmask (!%p368_p6), 64512   ;;  %v735_v30 = vld [vmem:[%s1773_s5 + $0x10] sm:$0xff] (!%p368_p6)  ;;  %vm744_vm8 = vcmask (!%p368_p6), 261120  }
  0x11   : > { %1316 = vmatpush3.bf16.msra.mxu0 (!%p368_p6), %v1313_v5  ;;  %v1327_v20 = vpack.c.bf16 (!%p368_p6), %v734_v19, %v733_v18  ;;  %v736_v31 = vld [vmem:[%s1773_s5 + $0x18] sm:$0xff] (!%p368_p6)  ;;  %v828_v33 = vld [vmem:[%s1775_s7] sm:$0xff] (!%p368_p6)  ;;  %v829_v34 = vld [vmem:[%s1775_s7 + $0x8] sm:$0xff] (!%p368_p6)  ;;  %vm843_vm9 = vcmask (!%p368_p6), 523264   ;;  %vm951_vm10 = vcmask (!%p368_p6), 7168  }
  0x12   : > { %1319 = vmatprep.subr.msk.bf16.mxu0 (!%p368_p6), %vm1318_vm2, %v1317_v7  ;;  %v1331_v32 = vpack.c.bf16 (!%p368_p6), %v736_v31, %v735_v30  ;;  %v1335_v35 = vpack.c.bf16 (!%p368_p6), %v829_v34, %v828_v33  ;;  %v830_v37 = vld [vmem:[%s1775_s7 + $0x10] sm:$0xff] (!%p368_p6)  ;;  %v831_v38 = vld [vmem:[%s1775_s7 + $0x18] sm:$0xff] (!%p368_p6)  ;;  %v832_v43 = vld [vmem:[%s1775_s7 + $0x20] sm:$0xff] (!%p368_p6) }
  0x13   : > { %1328 = vmatprep.subr.bf16.mxu1 (!%p368_p6), %v1327_v20  ;;  %v1339_v42 = vpack.c.bf16 (!%p368_p6), %v831_v38, %v830_v37  ;;  %v833_v44 = vld [vmem:[%s1775_s7 + $0x28] sm:$0xff] (!%p368_p6)  ;;  %v834_v46 = vld [vmem:[%s1775_s7 + $0x30] sm:$0xff] (!%p368_p6)  ;;  %v835_v47 = vld [vmem:[%s1775_s7 + $0x38] sm:$0xff] (!%p368_p6) }
  0x14   : > { %1330 = vmatpush3.bf16.msra.mxu1 (!%p368_p6), %v1327_v20  ;;  %v1343_v45 = vpack.c.bf16 (!%p368_p6), %v833_v44, %v832_v43  ;;  %v1347_v48 = vpack.c.bf16 (!%p368_p6), %v835_v47, %v834_v46  ;;  %v1203_v49 = vld [vmem:[%s1774_s6] ss:$0 sm:$0xff] (!%p368_p6) }
  0x15   : > { %s1657_s24 = scalar_select %p424_p7, %s1635_s27, 2  ;;  %1322 = vmatpush3.bf16.msk.msra.mxu0 %vm1318_vm2, %v1317_v7  ;;  %1332 = vmatprep.subr.bf16.mxu1 %v1331_v32  ;;  %v1206_v56 = vld [vmem:[%s1776_s8] ss:$0 sm:$0xff] }
  0x16   : > { %1324 = vmatprep.subr.bf16.mxu0 %v1323_v10  ;;  %v1209_v61 = vld [vmem:[%s1777_s9] ss:$0 sm:$0xff]  ;;  %s962_s13 = ssub.s32 (%p1630_p4), 3, %s1635_s27  ;;  %s1228_s19 = sshll.u32 (%p1630_p4), %s1618_s10, 4 }
  0x17   : > { %s1191_s28 = sshll.u32 %s1657_s24, 3  ;;  %v1210_v4 = vld [vmem:[#allocation2] ss:$0 sm:$0xff]  ;;  %p963_p8 = scmp.lt.s32.totalorder (%p1630_p4), %s962_s13, 2 }
  0x18   : > { %s427_s12 = scalar_lea.vmem %s1768_s0, %s1191_s28  ;;  %s441_s29 = scalar_lea.vmem %s1769_s1, %s1191_s28  ;;  %1334 = vmatpush3.bf16.msra.mxu1 %v1331_v32 }
  0x19   : > { %v452_v11 = vld [vmem:[%s427_s12] sm:$0xff]  ;;  %v453_v12 = vld [vmem:[%s427_s12 + $0x8] sm:$0xff]  ;;  %1336 = vmatprep.subr.bf16.mxu1 %v1335_v35  ;;  %s1189_s12 = sshll.u32 %s416_s30, 4  ;;  %s1734_s15 = scalar_lea.vmem (%p1630_p4), %s1779_s11, %s1228_s19  }
  0x1a   : > { %v1355_v13 = vtrunc.f32 %v452_v11  ;;  %v1357_v14 = vtrunc.f32 %v453_v12  ;;  %1268 = vmatprep.mubr.msk.f32.mxu0 %vm476_vm3, %v452_v11  ;;  %v644_v27 = vld [vmem:[%s441_s29] sm:$0xff]  ;;  %v645_v29 = vld [vmem:[%s441_s29 + $0x8] sm:$0xff]  ;;  %s1723_s24 = scalar_lea.vmem [#allocation3], %s1189_s12  }
  0x1b   : > { %1269 = vmatmul.mubr.msk.f32.vlgmr.msra.gmra.mrb[0].mxu0 %vm476_vm3, %v453_v12 }
  0x1c   : > { %v1356_v15 = vcvt.f32.s32 %v1355_v13  ;;  %v1358_v16 = vcvt.f32.s32 %v1357_v14  ;;  %1326 = vmatpush3.bf16.msra.mxu0 %v1323_v10 }
  0x1d   : > { %1278 = vmatprep.subr.mxu0 %v646_v17 }
  0x1e   : > { %459 = vperm.xlu0 %1450, %v1356_v15  }
  0x22   : > { %462 = vperm.xlu0 %1450, %v1358_v16  }
  0x9d   : > { %v460_v23 = vpop.permute.xlu0 %459 }
  0x9e   : > { %vm464_vm5 = vcmp.eq.s32.totalorder %v457_v22, %v460_v23 }
  0x9f   : > { %v1194_v25 = vsel %vm464_vm5, 1.0, %v1541_v24 }
  0xa0   : > { %1275 = vmatprep.mubr.msk.f32.mxu0 %vm562_vm4, %v1194_v25 }
  0xa1   : > { %v463_v26 = vpop.permute.xlu0 %462 }
  0xa2   : > { %vm465_vm6 = vcmp.eq.s32.totalorder %v457_v22, %v463_v26 }
  0xa3   : > { %v1195_v28 = vsel %vm465_vm6, 1.0, %v1541_v24 }
  0xa4   : > { %1276 = vmatmul.mubr.msk.f32.vlgmr.msra.gmra.mrb[0].mxu0 %vm562_vm4, %v1195_v28 }
  0xa5   : > { %1279 = vmatpush3.msra.mxu0 %v646_v17  ;;  %1280 = vmatprep.mubr.msk.f32.mxu0 %vm647_vm7, %v644_v27 }
  0xac   : > { %1281 = vmatmul.mubr.msk.f32.vlgmr.msra.gmra.mrb[0].mxu0 %vm647_vm7, %v645_v29 }
 0x17f   : > { %v1282_v36 = vpop.f32.mrb[0].mxu0 }
 0x180   : > { %v720_v39 = vpop.f32.mrb[1].mxu0  ;;  %v732_v41 = vmax.f32 %v1282_v36, 0.0 }
 0x181   : > { %v731_v40 = vmax.f32 %v720_v39, 0.0 }
 0x183   : > { %1291 = vmatprep.mubr.msk.f32.mxu1 %vm744_vm8, %v731_v40 }
 0x184   : > { %1292 = vmatmul.mubr.msk.f32.vlgmr.msra.gmra.mrb[0].mxu1 %vm744_vm8, %v732_v41 }
 0x185   : > { %1338 = vmatpush3.bf16.msra.mxu1 %v1335_v35 }
 0x186   : > { %1340 = vmatprep.subr.bf16.mxu1 %v1339_v42 }
 0x189   : > { %1342 = vmatpush3.bf16.msra.mxu1 %v1339_v42 }
 0x18a   : > { %1344 = vmatprep.subr.bf16.mxu1 %v1343_v45 }
 0x18d   : > { %1346 = vmatpush3.bf16.msra.mxu1 %v1343_v45 }
 0x18e   : > { %1348 = vmatprep.subr.bf16.mxu1 %v1347_v48 }
 0x191   : > { %1350 = vmatpush3.bf16.msra.mxu1 %v1347_v48 }
 0x257   : > { %v1293_v50 = vpop.f32.mrb[0].mxu1 }
 0x258   : > { %v823_v51 = vadd.f32 %v1293_v50, %v1203_v49  ;;  %v817_v52 = vpop.f32.mrb[1].mxu1 }
 0x259   : > { %v818_v53 = vadd.f32 %v1203_v49, %v817_v52 }
 0x25a   : > { %v827_v55 = vmax.f32 %v823_v51, 0.0 }
 0x25b   : > { %v826_v54 = vmax.f32 %v818_v53, 0.0 }
 0x25d   : > { %1310 = vmatprep.mubr.msk.f32.mxu1 %vm843_vm9, %v826_v54 }
 0x25e   : > { %1311 = vmatmul.mubr.msk.f32.vlgmr.msra.gmra.mrb[2].mxu1 %vm843_vm9, %v827_v55 }
 0x331   : > { %v1312_v57 = vpop.f32.mrb[2].mxu1 }
 0x332   : > { %v922_v58 = vadd.f32 %v1312_v57, %v1206_v56  ;;  %v916_v59 = vpop.f32.mrb[3].mxu1 }
 0x333   : > { %v917_v60 = vadd.f32 %v1206_v56, %v916_v59 }
 0x334   : > { %v926_v62 = vmax.f32 %v922_v58, 0.0 }
 0x335   : > { %v925_v63 = vmax.f32 %v917_v60, 0.0 }
 0x336   : > { %v935_v2 = vmul.f32 %v1209_v61, %v926_v62 }
 0x337   : > { %v934_v0 = vmul.f32 %v1209_v61, %v925_v63 }
 0x338   : > { %v939_v3 = vsel %vm744_vm8, %v935_v2, 0.0 }
 0x339   : > { %v936_v1 = vsel %vm744_vm8, %v934_v0, 0.0 }
 0x33a   : > { %937 = vadd.xlane.f32.xlu1 %v936_v1 }
 0x33e   : > { %940 = vadd.xlane.f32.xlu1 %v939_v3 }
 0x3c7   : > { %v938_v5 = vpop.xlane.xlu1 %937 }
 0x3c8   : > { %v949_v6 = vadd.f32 %v1210_v4, %v938_v5  ;;  %960 = sbr.rel (!%p1630_p4) target bundleno = 1024 (0x400), region = 68 }
 0x3ca   : > { %952 = vst.msk [vmem:[%s1723_s24] sm:$0xff] %vm951_vm10, %v949_v6 }
 0x3cb   : > { %v941_v7 = vpop.xlane.xlu1 %940 }
 0x3cc   : > { %v950_v8 = vadd.f32 %v1210_v4, %v941_v7 }
 0x3ce   : > { %953 = vst.msk [vmem:[%s1723_s24 + $0x8] sm:$0xff] %vm951_vm10, %v950_v8 }
 0x3cf   : > { %s1785_s13 = smov (!%p963_p8, %s962_s13), 2 }
 0x3d0   : > { %s1213_s16 = sshll.u32 %s1785_s13, 7 }
 0x3d1   : > { %p1216_p9 = scmp.eq.s32.totalorder %s1213_s16, 0 }
 0x3d2   : > { %s1740_s17 = sshrl.u32 (!%p1216_p9), %s1785_s13, 1 }
 0x3d3   : > { %971 = sbr.rel (%p1216_p9) target bundleno = 1024 (0x400), region = 72  ;;  %p1217_p10 = scmp.le.s32.totalorder (!%p1216_p9), %s1740_s17, 0 }
 0x3da   : > { %1135 = sbr.rel (%p1217_p10) target bundleno = 1003 (0x3eb), region = 151  ;;  %s1507_s10 = smov (!%p1217_p10), %s1734_s15  }
 0x3db   : > { %s1511_s26 = smov (!%p1217_p10), %s1723_s24   ;;  %s1515_s27 = smov (!%p1217_p10), 0  }
 0x3dc   : > { %s1519_s18 = smov (!%p1217_p10), 0  }
 0x3e1 LB: >> { %v1035_v9 = vld [vmem:[%s1513_s26] sm:$0xff]  ;;  %v1037_v10 = vld [vmem:[%s1513_s26 + $0x8] sm:$0xff]  ;;  %s1039_s21 = sadd.s32 1, %s1517_s27  ;;  %s1029_s18 = sadd.s32 1, %s1521_s18   ;;  %s1521_s18 = sphi %s1519_s18, %s1029_s18   ;;  %s1517_s27 = sphi %s1515_s27, %s1516_s27   ;;  %s1513_s26 = sphi %s1511_s26, %s1044_s26   ;;  %s1509_s10 = sphi %s1507_s10, %s1045_s10  }
 0x3e2   : >> { %1036 = vst [vmem:[%s1509_s10] sm:$0xff] %v1035_v9  ;;  %1038 = vst [vmem:[%s1509_s10 + $0x8] sm:$0xff] %v1037_v10  ;;  %p1040_p11 = scmp.ge.s32.totalorder %s1039_s21, %s1740_s17  ;;  %p1028_p12 = scmp.ge.s32.totalorder %s1029_s18, %s1740_s17 }
 0x3e4   : >> { %s1787_s21 = smov (%p1040_p11, %s1039_s21), 0  ;;  %1031 = sbr.rel (!%p1028_p12) target bundleno = 993 (0x3e1), region = 157 }
 0x3e5   : >> { %s1218_s23 = sshll.u32 %s1787_s21, 4  ;;  %s1516_s27 = smov %s1787_s21  }
 0x3e6   : >> { %s1044_s26 = scalar_lea.vmem %s1723_s24, %s1218_s23 [#allocation3]   ;;  %s1045_s10 = scalar_lea.vmem %s1734_s15, %s1218_s23  }
 0x3eb PF: > { %s1750_s29 = sand.u32 1, %s1785_s13   ;;  %s1229_s30 = sshll.u32 %s1740_s17, 4 }
 0x3ec   : > { %s1050_s12 = scalar_lea.vmem %s1723_s24, %s1229_s30 [#allocation3]   ;;  %s1052_s19 = scalar_lea.vmem %s1734_s15, %s1229_s30  }
 0x3ed   : > { %p1223_p13 = scmp.le.s32.totalorder %s1750_s29, 0 }
 0x3ee   : > { %s1523_s28 = smov (!%p1223_p13), %s1052_s19   ;;  %s1527_s14 = smov (!%p1223_p13), %s1050_s12  }
 0x3ef   : > { %1149 = sbr.rel (%p1223_p13) target bundleno = 1024 (0x400), region = 162  ;;  %s1531_s16 = smov (!%p1223_p13), 0  }
 0x3f0   : > { %s1535_s10 = smov (!%p1223_p13), 0  }
 0x3f6 LB: >> { %v1062_v11 = vld [vmem:[%s1529_s14] sm:$0xff]  ;;  %s1064_s13 = sadd.s32 1, %s1533_s16  ;;  %s1056_s10 = sadd.s32 1, %s1537_s10   ;;  %s1537_s10 = sphi %s1535_s10, %s1056_s10   ;;  %s1533_s16 = sphi %s1531_s16, %s1532_s16   ;;  %s1529_s14 = sphi %s1527_s14, %s1069_s14   ;;  %s1525_s28 = sphi %s1523_s28, %s1070_s28  }
 0x3f7   : >> { %1063 = vst [vmem:[%s1525_s28] sm:$0xff] %v1062_v11  ;;  %p1065_p0 = scmp.ge.s32.totalorder %s1064_s13, %s1750_s29  ;;  %p1055_p1 = scmp.ge.s32.totalorder %s1056_s10, %s1750_s29 }
 0x3f9   : >> { %s1789_s13 = smov (%p1065_p0, %s1064_s13), 0  ;;  %1058 = sbr.rel (!%p1055_p1) target bundleno = 1014 (0x3f6), region = 168 }
 0x3fa   : >> { %s1224_s24 = sshll.u32 %s1789_s13, 3  ;;  %s1532_s16 = smov %s1789_s13  }
 0x3fb   : >> { %s1069_s14 = scalar_lea.vmem %s1050_s12, %s1224_s24 [#allocation3]   ;;  %s1070_s28 = scalar_lea.vmem %s1052_s19, %s1224_s24  }
 0x400 PF: > { %p20_p2 = scmp.ge.s32.totalorder %s1620_s22, 4   ;;  %s1781_s19 = smov %s1501_s20 }
 0x401   : > { %s1782_s20 = smov %s1628_s25  ;;  %s1783_s21 = smov %s1620_s22 }
 0x402   :  { %22 = sbr.rel (!%p20_p2) target bundleno = 5 (0x5), region = 179 }

</bundles_post_ra>
